<compile_context>
chip_gen: v7x
topology: tpu7x:2x2x1
jax: 0.10.0
libtpu: 0.0.40
codegen_flags: <defaults>
</compile_context>

<pallas_src>
import functools

import jax
import jax.numpy as jnp
from jax.experimental import pallas as pl
from jax.experimental.pallas import tpu as pltpu


# ---------------------------------------------------------------------------
# helpers: generation-derived budgets / tile sizes
# ---------------------------------------------------------------------------
def _round_up(x, m):
    return (x + m - 1) // m * m


def _vmem_budget_bytes():
    """(tile-sizing budget, vmem_limit_bytes or None) derived from the chip."""
    try:
        info = pltpu.get_tpu_info()
        cap = getattr(info, "vmem_capacity_bytes", None)
        if cap:
            budget = int(cap) * 3 // 4          # ~96 MiB v5e/v6e, ~48 MiB v7x
            return budget, budget
    except Exception:
        pass
    return 48 * 1024 * 1024, None               # conservative, safe everywhere


def _mxu_tile_target():
    """MXU-native row tile: 128 on v4/v5e, 256 on v6e/v7x."""
    try:
        kind = jax.devices()[0].device_kind.lower()
        if "v4" in kind or "v5" in kind:
            return 128
    except Exception:
        pass
    return 256


def _select_tile(batch, d_main, d_dual, n_classes, feat_bytes, budget):
    """Largest MXU-friendly tile whose working set fits the VMEM budget."""
    t = min(_mxu_tile_target(), _round_up(max(batch, 1), 8))
    t = max(8, _round_up(t, 8))
    while t > 8:
        feats = 2 * 2 * t * (d_main + d_dual) * feat_bytes   # dbl-buffered blocks
        ys = 2 * 2 * t * n_classes * 4                       # resident y blocks
        logits = 4 * t * t * 4                               # s tile + exp temps
        if feats + ys + logits <= int(budget * 0.6):
            break
        t = max(8, t // 2)
    return t


# ---------------------------------------------------------------------------
# kernel
# ---------------------------------------------------------------------------
def _dual_contrastive_kernel(t_ref, ys_ref, yt_ref, fs_ref, ft_ref,
                             fsd_ref, ftd_ref, out_ref,
                             m_m, l_m, d_m, m_d, l_d, d_d, *,
                             inv_ct, batch, tile, mm_dtype):
    qi = pl.program_id(0)
    ki = pl.program_id(1)
    nk = pl.num_programs(1)
    needs_mask = (batch % tile) != 0            # compile-time constant

    @pl.when(ki == 0)
    def _init():
        m_m[...] = jnp.full(m_m.shape, -jnp.inf, dtype=jnp.float32)
        l_m[...] = jnp.zeros(l_m.shape, jnp.float32)
        d_m[...] = jnp.zeros(d_m.shape, jnp.float32)
        m_d[...] = jnp.full(m_d.shape, -jnp.inf, dtype=jnp.float32)
        l_d[...] = jnp.zeros(l_d.shape, jnp.float32)
        d_d[...] = jnp.zeros(d_d.shape, jnp.float32)

    def contrastive_step(fq_ref, fk_ref, m_ref, l_ref, diag_ref):
        fq = fq_ref[...].astype(jnp.float32)
        fk = fk_ref[...].astype(jnp.float32)
        # F.normalize: x / max(||x||, 1e-12) == x * rsqrt(max(||x||^2, 1e-24))
        inv_nq = jax.lax.rsqrt(
            jnp.maximum(jnp.sum(fq * fq, axis=-1, keepdims=True), 1e-24))
        inv_nk = jax.lax.rsqrt(
            jnp.maximum(jnp.sum(fk * fk, axis=-1, keepdims=True), 1e-24))
        fqn = (fq * inv_nq).astype(mm_dtype)
        fkn = (fk * inv_nk).astype(mm_dtype)

        # A @ B^T without materializing a transpose: contract last dim of both.
        s = jax.lax.dot_general(
            fqn, fkn, dimension_numbers=(((1,), (1,)), ((), ())),
            preferred_element_type=jnp.float32) * inv_ct           # [T, T]
        if needs_mask:
            key_ids = ki * tile + jax.lax.broadcasted_iota(jnp.int32, s.shape, 1)
            s = jnp.where(key_ids < batch, s, -1e30)

        # online logsumexp update
        m_new = jnp.maximum(m_ref[...], jnp.max(s, axis=-1, keepdims=True))
        alpha = jnp.exp(m_ref[...] - m_new)
        l_ref[...] = alpha * l_ref[...] + jnp.sum(jnp.exp(s - m_new),
                                                  axis=-1, keepdims=True)
        m_ref[...] = m_new

        # diagonal logits (labels == arange(B)): rows of the diagonal live in
        # the key block with ki == qi; row-wise dot, no iota masks on logits.
        @pl.when(ki == qi)
        def _diag():
            diag_ref[...] = jnp.sum(
                fqn.astype(jnp.float32) * fkn.astype(jnp.float32),
                axis=-1, keepdims=True) * inv_ct

    contrastive_step(fs_ref, ft_ref, m_m, l_m, d_m)
    contrastive_step(fsd_ref, ftd_ref, m_d, l_d, d_d)

    @pl.when(ki == nk - 1)
    def _finalize():
        # --- per-row KL distillation term (same query rows as this block) ---
        t = t_ref[0]                       # learnable temperature (SMEM scalar)
        inv_t = 1.0 / t
        ys = ys_ref[...].astype(jnp.float32) * inv_t
        yt = yt_ref[...].astype(jnp.float32) * inv_t

        ms = jnp.max(ys, axis=-1, keepdims=True)
        ss = ys - ms
        log_zs = jnp.log(jnp.sum(jnp.exp(ss), axis=-1, keepdims=True))
        log_p_s = ss - log_zs

        mt = jnp.max(yt, axis=-1, keepdims=True)
        st = yt - mt
        et = jnp.exp(st)
        zt = jnp.sum(et, axis=-1, keepdims=True)
        log_p_t = st - jnp.log(zt)
        p_t = et * pl.reciprocal(zt, approx=True)        # EUP slot, VALU-free

        kl_rows = jnp.sum(p_t * (log_p_t - log_p_s),
                          axis=-1, keepdims=True) * (t * t)

        # --- contrastive per-row losses: lse - diag ---
        lse_m = m_m[...] + jnp.log(l_m[...])
        lse_d = m_d[...] + jnp.log(l_d[...])
        rows = kl_rows + (lse_m - d_m[...]) + (lse_d - d_d[...])
        if needs_mask:
            row_ids = qi * tile + jax.lax.broadcasted_iota(
                jnp.int32, rows.shape, 0)
            rows = jnp.where(row_ids < batch, rows, 0.0)
        out_ref[...] = rows


# ---------------------------------------------------------------------------
# wrapper
# ---------------------------------------------------------------------------
def _pad_rows(x, rows):
    pad = rows - x.shape[0]
    return x if pad == 0 else jnp.pad(x, ((0, pad), (0, 0)))


def dual_contrastive_distill_kl(T, f_s, f_t, y_s, y_t, f_s_dual, f_t_dual,
                                temperature=0.07, matmul_dtype=None, tile=None):
    """JAX/Pallas equivalent of DualContrastiveDistillKL.forward."""
    f_s, f_t = jnp.atleast_2d(f_s), jnp.atleast_2d(f_t)
    y_s, y_t = jnp.atleast_2d(y_s), jnp.atleast_2d(y_t)
    f_s_dual, f_t_dual = jnp.atleast_2d(f_s_dual), jnp.atleast_2d(f_t_dual)

    # The PyTorch module uses one batch for every input (arange labels /
    # batchmean); we assume y_s.shape[0] == f_s.shape[0].
    B = f_s.shape[0]
    C = y_s.shape[1]
    D = f_s.shape[1]
    Dd = f_s_dual.shape[1]

    # matmul dtype policy: bf16 only when ALL features are bf16, unless forced.
    if matmul_dtype is not None:
        mm_dtype = jnp.dtype(matmul_dtype)
    elif all(a.dtype == jnp.bfloat16 for a in (f_s, f_t, f_s_dual, f_t_dual)):
        mm_dtype = jnp.dtype(jnp.bfloat16)
    else:
        mm_dtype = jnp.dtype(jnp.float32)

    budget, vmem_limit = _vmem_budget_bytes()
    feat_bytes = max(a.dtype.itemsize for a in (f_s, f_t, f_s_dual, f_t_dual))
    if tile is None:
        tile = _select_tile(B, D, Dd, C, feat_bytes, budget)
    else:
        tile = max(8, _round_up(int(tile), 8))
        tile = min(tile, _round_up(B, 8))

    bpad = _round_up(B, tile)
    nq = nk = bpad // tile

    # Zero-pad to the tile grid (no-op when B is already a multiple of `tile`).
    y_s_p, y_t_p = _pad_rows(y_s, bpad), _pad_rows(y_t, bpad)
    f_s_p, f_t_p = _pad_rows(f_s, bpad), _pad_rows(f_t, bpad)
    f_sd_p, f_td_p = _pad_rows(f_s_dual, bpad), _pad_rows(f_t_dual, bpad)

    T = jnp.asarray(T, jnp.float32).reshape((1,))

    kernel = functools.partial(
        _dual_contrastive_kernel,
        inv_ct=float(1.0 / temperature), batch=B, tile=tile, mm_dtype=mm_dtype)

    cp_kwargs = dict(dimension_semantics=("parallel", "arbitrary"))
    if vmem_limit is not None:
        cp_kwargs["vmem_limit_bytes"] = int(vmem_limit)

    out = pl.pallas_call(
        kernel,
        out_shape=jax.ShapeDtypeStruct((bpad, 1), jnp.float32),
        grid_spec=pltpu.PrefetchScalarGridSpec(
            num_scalar_prefetch=0,
            grid=(nq, nk),
            in_specs=[
                pl.BlockSpec(memory_space=pltpu.MemorySpace.SMEM),       # T
                pl.BlockSpec((tile, C), lambda qi, ki: (qi, 0)),         # y_s
                pl.BlockSpec((tile, C), lambda qi, ki: (qi, 0)),         # y_t
                pl.BlockSpec((tile, D), lambda qi, ki: (qi, 0)),         # f_s (q)
                pl.BlockSpec((tile, D), lambda qi, ki: (ki, 0)),         # f_t (k)
                pl.BlockSpec((tile, Dd), lambda qi, ki: (qi, 0)),        # f_s_dual
                pl.BlockSpec((tile, Dd), lambda qi, ki: (ki, 0)),        # f_t_dual
            ],
            out_specs=pl.BlockSpec((tile, 1), lambda qi, ki: (qi, 0)),
            scratch_shapes=[pltpu.VMEM((tile, 1), jnp.float32)] * 6,
        ),
        compiler_params=pltpu.CompilerParams(**cp_kwargs),
    )(T, y_s_p, y_t_p, f_s_p, f_t_p, f_sd_p, f_td_p)

    return jnp.sum(out[:B, 0]) / B


# ---------------------------------------------------------------------------
# pure-JAX reference + self-test
# ---------------------------------------------------------------------------
def _reference(T, f_s, f_t, y_s, y_t, f_s_dual, f_t_dual, temperature=0.07):
    T = jnp.float32(T)
    p_s = jax.nn.log_softmax(y_s / T, axis=-1)
    log_p_t = jax.nn.log_softmax(y_t / T, axis=-1)
    p_t = jnp.exp(log_p_t)
    kl = jnp.sum(p_t * (log_p_t - p_s)) / y_s.shape[0] * T ** 2

    def ce(a, b):
        a = a / jnp.maximum(jnp.linalg.norm(a, axis=-1, keepdims=True), 1e-12)
        b = b / jnp.maximum(jnp.linalg.norm(b, axis=-1, keepdims=True), 1e-12)
        logits = a @ b.T / temperature
        lse = jax.nn.logsumexp(logits, axis=-1)
        return jnp.mean(lse - jnp.diag(logits))

    return kl + ce(f_s, f_t) + ce(f_s_dual, f_t_dual)


if __name__ == "__main__":
    initial_T = 4.0

    def run_case(seed, B, C, D, Dd, tile=None):
        ks = jax.random.split(jax.random.PRNGKey(seed), 6)
        y_s = jax.random.normal(ks[0], (B, C), jnp.float32)
        y_t = jax.random.normal(ks[1], (B, C), jnp.float32)
        f_s = jax.random.normal(ks[2], (B, D), jnp.float32)
        f_t = jax.random.normal(ks[3], (B, D), jnp.float32)
        f_sd = jax.random.normal(ks[4], (B, Dd), jnp.float32)
        f_td = jax.random.normal(ks[5], (B, Dd), jnp.float32)

        loss = dual_contrastive_distill_kl(initial_T, f_s, f_t, y_s, y_t,
                                           f_sd, f_td, tile=tile)
        loss = jax.block_until_ready(loss)
        ref = _reference(initial_T, f_s, f_t, y_s, y_t, f_sd, f_td)
        assert jnp.allclose(loss, ref, rtol=1e-3, atol=1e-3), (B, loss, ref)

    # single block, no padding
    run_case(0, B=8, C=16, D=32, Dd=64)
    # 3x3 grid: exercises the online logsumexp, the ki==qi diagonal path and
    # the padded-key masking (B=20 padded to 24 with tile=8)
    run_case(0, B=20, C=16, D=32, Dd=64, tile=8)

    print("KERNEL_OK")
</pallas_src>

<mosaic_0001>
module attributes {stable_mosaic.version = 11 : i64} {
  func.func @_dual_contrastive_kernel(%arg0: i32, %arg1: i32, %arg2: memref<1xf32, #tpu.memory_space<smem>>, %arg3: memref<8x16xf32, #tpu.memory_space<vmem>>, %arg4: memref<8x16xf32, #tpu.memory_space<vmem>>, %arg5: memref<8x32xf32, #tpu.memory_space<vmem>>, %arg6: memref<8x32xf32, #tpu.memory_space<vmem>>, %arg7: memref<8x64xf32, #tpu.memory_space<vmem>>, %arg8: memref<8x64xf32, #tpu.memory_space<vmem>>, %arg9: memref<8x1xf32, #tpu.memory_space<vmem>>, %arg10: memref<8x1xf32, #tpu.memory_space<vmem>>, %arg11: memref<8x1xf32, #tpu.memory_space<vmem>>, %arg12: memref<8x1xf32, #tpu.memory_space<vmem>>, %arg13: memref<8x1xf32, #tpu.memory_space<vmem>>, %arg14: memref<8x1xf32, #tpu.memory_space<vmem>>, %arg15: memref<8x1xf32, #tpu.memory_space<vmem>>) attributes {dimension_semantics = [#tpu.dimension_semantics<parallel>, #tpu.dimension_semantics<arbitrary>], iteration_bounds = array<i64: 1, 1>, scalar_prefetch = 0 : i64, scratch_operands = 6 : i64, tpu.core_type = #tpu.core_type<tc>, window_params = [{transform_indices = @transform_0, window_bounds = array<i64: 1>}, {transform_indices = @transform_1, window_bounds = array<i64: 8, 16>}, {transform_indices = @transform_2, window_bounds = array<i64: 8, 16>}, {transform_indices = @transform_3, window_bounds = array<i64: 8, 32>}, {transform_indices = @transform_4, window_bounds = array<i64: 8, 32>}, {transform_indices = @transform_5, window_bounds = array<i64: 8, 64>}, {transform_indices = @transform_6, window_bounds = array<i64: 8, 64>}, {transform_indices = @transform_7, window_bounds = array<i64: 8, 1>}]} {
    %c0_i32 = arith.constant 0 : i32
    %0 = arith.cmpi eq, %arg1, %c0_i32 : i32
    %1 = arith.extui %0 : i1 to i32
    %c0_i32_0 = arith.constant 0 : i32
    %2 = arith.cmpi ne, %1, %c0_i32_0 : i32
    scf.if %2 {
      %cst_47 = arith.constant 0xFF800000 : f32
      %88 = vector.broadcast %cst_47 : f32 to vector<8x1xf32>
      %c0_48 = arith.constant 0 : index
      %c0_49 = arith.constant 0 : index
      %89 = vector.load %arg10[%c0_48, %c0_49] : memref<8x1xf32, #tpu.memory_space<vmem>>, vector<8x1xf32>
      tpu.vector_store %arg10[%c0_48, %c0_49], %88 {strides = array<i32>} : memref<8x1xf32, #tpu.memory_space<vmem>>, vector<8x1xf32>,
      %cst_50 = arith.constant 0.000000e+00 : f32
      %90 = vector.broadcast %cst_50 : f32 to vector<8x1xf32>
      %c0_51 = arith.constant 0 : index
      %c0_52 = arith.constant 0 : index
      %91 = vector.load %arg11[%c0_51, %c0_52] : memref<8x1xf32, #tpu.memory_space<vmem>>, vector<8x1xf32>
      tpu.vector_store %arg11[%c0_51, %c0_52], %90 {strides = array<i32>} : memref<8x1xf32, #tpu.memory_space<vmem>>, vector<8x1xf32>,
      %cst_53 = arith.constant 0.000000e+00 : f32
      %92 = vector.broadcast %cst_53 : f32 to vector<8x1xf32>
      %c0_54 = arith.constant 0 : index
      %c0_55 = arith.constant 0 : index
      %93 = vector.load %arg12[%c0_54, %c0_55] : memref<8x1xf32, #tpu.memory_space<vmem>>, vector<8x1xf32>
      tpu.vector_store %arg12[%c0_54, %c0_55], %92 {strides = array<i32>} : memref<8x1xf32, #tpu.memory_space<vmem>>, vector<8x1xf32>,
      %cst_56 = arith.constant 0xFF800000 : f32
      %94 = vector.broadcast %cst_56 : f32 to vector<8x1xf32>
      %c0_57 = arith.constant 0 : index
      %c0_58 = arith.constant 0 : index
      %95 = vector.load %arg13[%c0_57, %c0_58] : memref<8x1xf32, #tpu.memory_space<vmem>>, vector<8x1xf32>
      tpu.vector_store %arg13[%c0_57, %c0_58], %94 {strides = array<i32>} : memref<8x1xf32, #tpu.memory_space<vmem>>, vector<8x1xf32>,
      %cst_59 = arith.constant 0.000000e+00 : f32
      %96 = vector.broadcast %cst_59 : f32 to vector<8x1xf32>
      %c0_60 = arith.constant 0 : index
      %c0_61 = arith.constant 0 : index
      %97 = vector.load %arg14[%c0_60, %c0_61] : memref<8x1xf32, #tpu.memory_space<vmem>>, vector<8x1xf32>
      tpu.vector_store %arg14[%c0_60, %c0_61], %96 {strides = array<i32>} : memref<8x1xf32, #tpu.memory_space<vmem>>, vector<8x1xf32>,
      %cst_62 = arith.constant 0.000000e+00 : f32
      %98 = vector.broadcast %cst_62 : f32 to vector<8x1xf32>
      %c0_63 = arith.constant 0 : index
      %c0_64 = arith.constant 0 : index
      %99 = vector.load %arg15[%c0_63, %c0_64] : memref<8x1xf32, #tpu.memory_space<vmem>>, vector<8x1xf32>
      tpu.vector_store %arg15[%c0_63, %c0_64], %98 {strides = array<i32>} : memref<8x1xf32, #tpu.memory_space<vmem>>, vector<8x1xf32>,
    } else {
    }
    %c0 = arith.constant 0 : index
    %c0_1 = arith.constant 0 : index
    %3 = vector.load %arg5[%c0, %c0_1] : memref<8x32xf32, #tpu.memory_space<vmem>>, vector<8x32xf32>
    %c0_2 = arith.constant 0 : index
    %c0_3 = arith.constant 0 : index
    %4 = vector.load %arg6[%c0_2, %c0_3] : memref<8x32xf32, #tpu.memory_space<vmem>>, vector<8x32xf32>
    %5 = arith.mulf %3, %3 : vector<8x32xf32>
    %cst = arith.constant dense<0.000000e+00> : vector<8xf32>
    %6 = vector.multi_reduction <add>, %5, %cst [1] : vector<8x32xf32> to vector<8xf32>
    %7 = vector.shape_cast %6 : vector<8xf32> to vector<8x1xf32>
    %cst_4 = arith.constant 1.000000e-24 : f32
    %8 = vector.broadcast %cst_4 : f32 to vector<8x1xf32>
    %9 = arith.maximumf %7, %8 : vector<8x1xf32>
    %10 = math.rsqrt %9 : vector<8x1xf32>
    %11 = arith.mulf %4, %4 : vector<8x32xf32>
    %cst_5 = arith.constant dense<0.000000e+00> : vector<8xf32>
    %12 = vector.multi_reduction <add>, %11, %cst_5 [1] : vector<8x32xf32> to vector<8xf32>
    %13 = vector.shape_cast %12 : vector<8xf32> to vector<8x1xf32>
    %cst_6 = arith.constant 1.000000e-24 : f32
    %14 = vector.broadcast %cst_6 : f32 to vector<8x1xf32>
    %15 = arith.maximumf %13, %14 : vector<8x1xf32>
    %16 = math.rsqrt %15 : vector<8x1xf32>
    %17 = vector.broadcast %10 : vector<8x1xf32> to vector<8x32xf32>
    %18 = arith.mulf %3, %17 : vector<8x32xf32>
    %19 = vector.broadcast %16 : vector<8x1xf32> to vector<8x32xf32>
    %20 = arith.mulf %4, %19 : vector<8x32xf32>
    %cst_7 = arith.constant dense<0.000000e+00> : vector<8x8xf32>
    %21 = tpu.matmul %18, %20, %cst_7 {dimension_numbers = #tpu.dot_dimension_numbers<[1], [1], [0], [0], [0, 0, 1, 0], [], []>} : vector<8x32xf32>, vector<8x32xf32>, vector<8x8xf32> -> vector<8x8xf32>
    %cst_8 = arith.constant 14.2857141 : f32
    %22 = vector.broadcast %cst_8 : f32 to vector<8x8xf32>
    %23 = arith.mulf %21, %22 : vector<8x8xf32>
    %c0_9 = arith.constant 0 : index
    %c0_10 = arith.constant 0 : index
    %24 = vector.load %arg10[%c0_9, %c0_10] : memref<8x1xf32, #tpu.memory_space<vmem>>, vector<8x1xf32>
    %cst_11 = arith.constant dense<0xFF800000> : vector<8xf32>
    %25 = vector.multi_reduction <maximumf>, %23, %cst_11 [1] : vector<8x8xf32> to vector<8xf32>
    %26 = vector.shape_cast %25 : vector<8xf32> to vector<8x1xf32>
    %27 = arith.maximumf %24, %26 : vector<8x1xf32>
    %c0_12 = arith.constant 0 : index
    %c0_13 = arith.constant 0 : index
    %28 = vector.load %arg10[%c0_12, %c0_13] : memref<8x1xf32, #tpu.memory_space<vmem>>, vector<8x1xf32>
    %29 = arith.subf %28, %27 : vector<8x1xf32>
    %30 = math.exp %29 : vector<8x1xf32>
    %c0_14 = arith.constant 0 : index
    %c0_15 = arith.constant 0 : index
    %31 = vector.load %arg11[%c0_14, %c0_15] : memref<8x1xf32, #tpu.memory_space<vmem>>, vector<8x1xf32>
    %32 = arith.mulf %30, %31 : vector<8x1xf32>
    %33 = vector.broadcast %27 : vector<8x1xf32> to vector<8x8xf32>
    %34 = arith.subf %23, %33 : vector<8x8xf32>
    %35 = math.exp %34 : vector<8x8xf32>
    %cst_16 = arith.constant dense<0.000000e+00> : vector<8xf32>
    %36 = vector.multi_reduction <add>, %35, %cst_16 [1] : vector<8x8xf32> to vector<8xf32>
    %37 = vector.shape_cast %36 : vector<8xf32> to vector<8x1xf32>
    %38 = arith.addf %32, %37 : vector<8x1xf32>
    %c0_17 = arith.constant 0 : index
    %c0_18 = arith.constant 0 : index
    %39 = vector.load %arg11[%c0_17, %c0_18] : memref<8x1xf32, #tpu.memory_space<vmem>>, vector<8x1xf32>
    tpu.vector_store %arg11[%c0_17, %c0_18], %38 {strides = array<i32>} : memref<8x1xf32, #tpu.memory_space<vmem>>, vector<8x1xf32>,
    %c0_19 = arith.constant 0 : index
    %c0_20 = arith.constant 0 : index
    %40 = vector.load %arg10[%c0_19, %c0_20] : memref<8x1xf32, #tpu.memory_space<vmem>>, vector<8x1xf32>
    tpu.vector_store %arg10[%c0_19, %c0_20], %27 {strides = array<i32>} : memref<8x1xf32, #tpu.memory_space<vmem>>, vector<8x1xf32>,
    %41 = arith.cmpi eq, %arg1, %arg0 : i32
    %42 = arith.extui %41 : i1 to i32
    %c0_i32_21 = arith.constant 0 : i32
    %43 = arith.cmpi ne, %42, %c0_i32_21 : i32
    scf.if %43 {
      %88 = arith.mulf %18, %20 : vector<8x32xf32>
      %cst_47 = arith.constant dense<0.000000e+00> : vector<8xf32>
      %89 = vector.multi_reduction <add>, %88, %cst_47 [1] : vector<8x32xf32> to vector<8xf32>
      %90 = vector.shape_cast %89 : vector<8xf32> to vector<8x1xf32>
      %cst_48 = arith.constant 14.2857141 : f32
      %91 = vector.broadcast %cst_48 : f32 to vector<8x1xf32>
      %92 = arith.mulf %90, %91 : vector<8x1xf32>
      %c0_49 = arith.constant 0 : index
      %c0_50 = arith.constant 0 : index
      %93 = vector.load %arg12[%c0_49, %c0_50] : memref<8x1xf32, #tpu.memory_space<vmem>>, vector<8x1xf32>
      tpu.vector_store %arg12[%c0_49, %c0_50], %92 {strides = array<i32>} : memref<8x1xf32, #tpu.memory_space<vmem>>, vector<8x1xf32>,
    } else {
    }
    %c0_22 = arith.constant 0 : index
    %c0_23 = arith.constant 0 : index
    %44 = vector.load %arg7[%c0_22, %c0_23] : memref<8x64xf32, #tpu.memory_space<vmem>>, vector<8x64xf32>
    %c0_24 = arith.constant 0 : index
    %c0_25 = arith.constant 0 : index
    %45 = vector.load %arg8[%c0_24, %c0_25] : memref<8x64xf32, #tpu.memory_space<vmem>>, vector<8x64xf32>
    %46 = arith.mulf %44, %44 : vector<8x64xf32>
    %cst_26 = arith.constant dense<0.000000e+00> : vector<8xf32>
    %47 = vector.multi_reduction <add>, %46, %cst_26 [1] : vector<8x64xf32> to vector<8xf32>
    %48 = vector.shape_cast %47 : vector<8xf32> to vector<8x1xf32>
    %cst_27 = arith.constant 1.000000e-24 : f32
    %49 = vector.broadcast %cst_27 : f32 to vector<8x1xf32>
    %50 = arith.maximumf %48, %49 : vector<8x1xf32>
    %51 = math.rsqrt %50 : vector<8x1xf32>
    %52 = arith.mulf %45, %45 : vector<8x64xf32>
    %cst_28 = arith.constant dense<0.000000e+00> : vector<8xf32>
    %53 = vector.multi_reduction <add>, %52, %cst_28 [1] : vector<8x64xf32> to vector<8xf32>
    %54 = vector.shape_cast %53 : vector<8xf32> to vector<8x1xf32>
    %cst_29 = arith.constant 1.000000e-24 : f32
    %55 = vector.broadcast %cst_29 : f32 to vector<8x1xf32>
    %56 = arith.maximumf %54, %55 : vector<8x1xf32>
    %57 = math.rsqrt %56 : vector<8x1xf32>
    %58 = vector.broadcast %51 : vector<8x1xf32> to vector<8x64xf32>
    %59 = arith.mulf %44, %58 : vector<8x64xf32>
    %60 = vector.broadcast %57 : vector<8x1xf32> to vector<8x64xf32>
    %61 = arith.mulf %45, %60 : vector<8x64xf32>
    %cst_30 = arith.constant dense<0.000000e+00> : vector<8x8xf32>
    %62 = tpu.matmul %59, %61, %cst_30 {dimension_numbers = #tpu.dot_dimension_numbers<[1], [1], [0], [0], [0, 0, 1, 0], [], []>} : vector<8x64xf32>, vector<8x64xf32>, vector<8x8xf32> -> vector<8x8xf32>
    %cst_31 = arith.constant 14.2857141 : f32
    %63 = vector.broadcast %cst_31 : f32 to vector<8x8xf32>
    %64 = arith.mulf %62, %63 : vector<8x8xf32>
    %c0_32 = arith.constant 0 : index
    %c0_33 = arith.constant 0 : index
    %65 = vector.load %arg13[%c0_32, %c0_33] : memref<8x1xf32, #tpu.memory_space<vmem>>, vector<8x1xf32>
    %cst_34 = arith.constant dense<0xFF800000> : vector<8xf32>
    %66 = vector.multi_reduction <maximumf>, %64, %cst_34 [1] : vector<8x8xf32> to vector<8xf32>
    %67 = vector.shape_cast %66 : vector<8xf32> to vector<8x1xf32>
    %68 = arith.maximumf %65, %67 : vector<8x1xf32>
    %c0_35 = arith.constant 0 : index
    %c0_36 = arith.constant 0 : index
    %69 = vector.load %arg13[%c0_35, %c0_36] : memref<8x1xf32, #tpu.memory_space<vmem>>, vector<8x1xf32>
    %70 = arith.subf %69, %68 : vector<8x1xf32>
    %71 = math.exp %70 : vector<8x1xf32>
    %c0_37 = arith.constant 0 : index
    %c0_38 = arith.constant 0 : index
    %72 = vector.load %arg14[%c0_37, %c0_38] : memref<8x1xf32, #tpu.memory_space<vmem>>, vector<8x1xf32>
    %73 = arith.mulf %71, %72 : vector<8x1xf32>
    %74 = vector.broadcast %68 : vector<8x1xf32> to vector<8x8xf32>
    %75 = arith.subf %64, %74 : vector<8x8xf32>
    %76 = math.exp %75 : vector<8x8xf32>
    %cst_39 = arith.constant dense<0.000000e+00> : vector<8xf32>
    %77 = vector.multi_reduction <add>, %76, %cst_39 [1] : vector<8x8xf32> to vector<8xf32>
    %78 = vector.shape_cast %77 : vector<8xf32> to vector<8x1xf32>
    %79 = arith.addf %73, %78 : vector<8x1xf32>
    %c0_40 = arith.constant 0 : index
    %c0_41 = arith.constant 0 : index
    %80 = vector.load %arg14[%c0_40, %c0_41] : memref<8x1xf32, #tpu.memory_space<vmem>>, vector<8x1xf32>
    tpu.vector_store %arg14[%c0_40, %c0_41], %79 {strides = array<i32>} : memref<8x1xf32, #tpu.memory_space<vmem>>, vector<8x1xf32>,
    %c0_42 = arith.constant 0 : index
    %c0_43 = arith.constant 0 : index
    %81 = vector.load %arg13[%c0_42, %c0_43] : memref<8x1xf32, #tpu.memory_space<vmem>>, vector<8x1xf32>
    tpu.vector_store %arg13[%c0_42, %c0_43], %68 {strides = array<i32>} : memref<8x1xf32, #tpu.memory_space<vmem>>, vector<8x1xf32>,
    %82 = arith.cmpi eq, %arg1, %arg0 : i32
    %83 = arith.extui %82 : i1 to i32
    %c0_i32_44 = arith.constant 0 : i32
    %84 = arith.cmpi ne, %83, %c0_i32_44 : i32
    scf.if %84 {
      %88 = arith.mulf %59, %61 : vector<8x64xf32>
      %cst_47 = arith.constant dense<0.000000e+00> : vector<8xf32>
      %89 = vector.multi_reduction <add>, %88, %cst_47 [1] : vector<8x64xf32> to vector<8xf32>
      %90 = vector.shape_cast %89 : vector<8xf32> to vector<8x1xf32>
      %cst_48 = arith.constant 14.2857141 : f32
      %91 = vector.broadcast %cst_48 : f32 to vector<8x1xf32>
      %92 = arith.mulf %90, %91 : vector<8x1xf32>
      %c0_49 = arith.constant 0 : index
      %c0_50 = arith.constant 0 : index
      %93 = vector.load %arg15[%c0_49, %c0_50] : memref<8x1xf32, #tpu.memory_space<vmem>>, vector<8x1xf32>
      tpu.vector_store %arg15[%c0_49, %c0_50], %92 {strides = array<i32>} : memref<8x1xf32, #tpu.memory_space<vmem>>, vector<8x1xf32>,
    } else {
    }
    %c0_i32_45 = arith.constant 0 : i32
    %85 = arith.cmpi eq, %arg1, %c0_i32_45 : i32
    %86 = arith.extui %85 : i1 to i32
    %c0_i32_46 = arith.constant 0 : i32
    %87 = arith.cmpi ne, %86, %c0_i32_46 : i32
    scf.if %87 {
      %c0_47 = arith.constant 0 : index
      %88 = memref.load %arg2[%c0_47] : memref<1xf32, #tpu.memory_space<smem>>
      %cst_48 = arith.constant 1.000000e+00 : f32
      %89 = arith.divf %cst_48, %88 : f32
      %c0_49 = arith.constant 0 : index
      %c0_50 = arith.constant 0 : index
      %90 = vector.load %arg3[%c0_49, %c0_50] : memref<8x16xf32, #tpu.memory_space<vmem>>, vector<8x16xf32>
      %91 = vector.broadcast %89 : f32 to vector<8x16xf32>
      %92 = arith.mulf %90, %91 : vector<8x16xf32>
      %c0_51 = arith.constant 0 : index
      %c0_52 = arith.constant 0 : index
      %93 = vector.load %arg4[%c0_51, %c0_52] : memref<8x16xf32, #tpu.memory_space<vmem>>, vector<8x16xf32>
      %94 = vector.broadcast %89 : f32 to vector<8x16xf32>
      %95 = arith.mulf %93, %94 : vector<8x16xf32>
      %cst_53 = arith.constant dense<0xFF800000> : vector<8xf32>
      %96 = vector.multi_reduction <maximumf>, %92, %cst_53 [1] : vector<8x16xf32> to vector<8xf32>
      %97 = vector.shape_cast %96 : vector<8xf32> to vector<8x1xf32>
      %98 = vector.broadcast %97 : vector<8x1xf32> to vector<8x16xf32>
      %99 = arith.subf %92, %98 : vector<8x16xf32>
      %100 = math.exp %99 : vector<8x16xf32>
      %cst_54 = arith.constant dense<0.000000e+00> : vector<8xf32>
      %101 = vector.multi_reduction <add>, %100, %cst_54 [1] : vector<8x16xf32> to vector<8xf32>
      %102 = vector.shape_cast %101 : vector<8xf32> to vector<8x1xf32>
      %103 = math.log %102 : vector<8x1xf32>
      %104 = vector.broadcast %103 : vector<8x1xf32> to vector<8x16xf32>
      %105 = arith.subf %99, %104 : vector<8x16xf32>
      %cst_55 = arith.constant dense<0xFF800000> : vector<8xf32>
      %106 = vector.multi_reduction <maximumf>, %95, %cst_55 [1] : vector<8x16xf32> to vector<8xf32>
      %107 = vector.shape_cast %106 : vector<8xf32> to vector<8x1xf32>
      %108 = vector.broadcast %107 : vector<8x1xf32> to vector<8x16xf32>
      %109 = arith.subf %95, %108 : vector<8x16xf32>
      %110 = math.exp %109 : vector<8x16xf32>
      %cst_56 = arith.constant dense<0.000000e+00> : vector<8xf32>
      %111 = vector.multi_reduction <add>, %110, %cst_56 [1] : vector<8x16xf32> to vector<8xf32>
      %112 = vector.shape_cast %111 : vector<8xf32> to vector<8x1xf32>
      %113 = math.log %112 : vector<8x1xf32>
      %114 = vector.broadcast %113 : vector<8x1xf32> to vector<8x16xf32>
      %115 = arith.subf %109, %114 : vector<8x16xf32>
      %116 = tpu.reciprocal %112 {approx = true} : vector<8x1xf32> -> vector<8x1xf32>
      %117 = vector.broadcast %116 : vector<8x1xf32> to vector<8x16xf32>
      %118 = arith.mulf %110, %117 : vector<8x16xf32>
      %119 = arith.subf %115, %105 : vector<8x16xf32>
      %120 = arith.mulf %118, %119 : vector<8x16xf32>
      %cst_57 = arith.constant dense<0.000000e+00> : vector<8xf32>
      %121 = vector.multi_reduction <add>, %120, %cst_57 [1] : vector<8x16xf32> to vector<8xf32>
      %122 = vector.shape_cast %121 : vector<8xf32> to vector<8x1xf32>
      %123 = arith.mulf %88, %88 : f32
      %124 = vector.broadcast %123 : f32 to vector<8x1xf32>
      %125 = arith.mulf %122, %124 : vector<8x1xf32>
      %c0_58 = arith.constant 0 : index
      %c0_59 = arith.constant 0 : index
      %126 = vector.load %arg10[%c0_58, %c0_59] : memref<8x1xf32, #tpu.memory_space<vmem>>, vector<8x1xf32>
      %c0_60 = arith.constant 0 : index
      %c0_61 = arith.constant 0 : index
      %127 = vector.load %arg11[%c0_60, %c0_61] : memref<8x1xf32, #tpu.memory_space<vmem>>, vector<8x1xf32>
      %128 = math.log %127 : vector<8x1xf32>
      %129 = arith.addf %126, %128 : vector<8x1xf32>
      %c0_62 = arith.constant 0 : index
      %c0_63 = arith.constant 0 : index
      %130 = vector.load %arg13[%c0_62, %c0_63] : memref<8x1xf32, #tpu.memory_space<vmem>>, vector<8x1xf32>
      %c0_64 = arith.constant 0 : index
      %c0_65 = arith.constant 0 : index
      %131 = vector.load %arg14[%c0_64, %c0_65] : memref<8x1xf32, #tpu.memory_space<vmem>>, vector<8x1xf32>
      %132 = math.log %131 : vector<8x1xf32>
      %133 = arith.addf %130, %132 : vector<8x1xf32>
      %c0_66 = arith.constant 0 : index
      %c0_67 = arith.constant 0 : index
      %134 = vector.load %arg12[%c0_66, %c0_67] : memref<8x1xf32, #tpu.memory_space<vmem>>, vector<8x1xf32>
      %135 = arith.subf %129, %134 : vector<8x1xf32>
      %136 = arith.addf %125, %135 : vector<8x1xf32>
      %c0_68 = arith.constant 0 : index
      %c0_69 = arith.constant 0 : index
      %137 = vector.load %arg15[%c0_68, %c0_69] : memref<8x1xf32, #tpu.memory_space<vmem>>, vector<8x1xf32>
      %138 = arith.subf %133, %137 : vector<8x1xf32>
      %139 = arith.addf %136, %138 : vector<8x1xf32>
      %c0_70 = arith.constant 0 : index
      %c0_71 = arith.constant 0 : index
      %140 = vector.load %arg9[%c0_70, %c0_71] : memref<8x1xf32, #tpu.memory_space<vmem>>, vector<8x1xf32>
      tpu.vector_store %arg9[%c0_70, %c0_71], %139 {strides = array<i32>} : memref<8x1xf32, #tpu.memory_space<vmem>>, vector<8x1xf32>,
    } else {
    }
    return
  }
  func.func @transform_0(%arg0: i32, %arg1: i32) -> i32 {
    %c0_i32 = arith.constant 0 : i32
    %c0_i32_0 = arith.constant 0 : i32
    return %c0_i32 : i32
  }
  func.func @transform_1(%arg0: i32, %arg1: i32) -> (i32, i32) {
    %c0_i32 = arith.constant 0 : i32
    %c0_i32_0 = arith.constant 0 : i32
    return %arg0, %c0_i32 : i32, i32
  }
  func.func @transform_2(%arg0: i32, %arg1: i32) -> (i32, i32) {
    %c0_i32 = arith.constant 0 : i32
    %c0_i32_0 = arith.constant 0 : i32
    return %arg0, %c0_i32 : i32, i32
  }
  func.func @transform_3(%arg0: i32, %arg1: i32) -> (i32, i32) {
    %c0_i32 = arith.constant 0 : i32
    %c0_i32_0 = arith.constant 0 : i32
    return %arg0, %c0_i32 : i32, i32
  }
  func.func @transform_4(%arg0: i32, %arg1: i32) -> (i32, i32) {
    %c0_i32 = arith.constant 0 : i32
    %c0_i32_0 = arith.constant 0 : i32
    return %arg1, %c0_i32 : i32, i32
  }
  func.func @transform_5(%arg0: i32, %arg1: i32) -> (i32, i32) {
    %c0_i32 = arith.constant 0 : i32
    %c0_i32_0 = arith.constant 0 : i32
    return %arg0, %c0_i32 : i32, i32
  }
  func.func @transform_6(%arg0: i32, %arg1: i32) -> (i32, i32) {
    %c0_i32 = arith.constant 0 : i32
    %c0_i32_0 = arith.constant 0 : i32
    return %arg1, %c0_i32 : i32, i32
  }
  func.func @transform_7(%arg0: i32, %arg1: i32) -> (i32, i32) {
    %c0_i32 = arith.constant 0 : i32
    %c0_i32_0 = arith.constant 0 : i32
    return %arg0, %c0_i32 : i32, i32
  }
}

</mosaic_0001>

<bundles_post_ra>
// kernel: tpu_custom_call.1
= control target key start
LH: loop header
LB: loop body
LE: loop exit
PB: predicated region body
PF: predicated region fallthrough
CT: control target
= control target key end

     0   :  { %13 = vsyncpa [#allocation10], 0  ;;  %s726_s0 = inlined_call_operand.<no memory space> [shape: f32[1], index: 0, kind: input, shape index: {}]   ;;  %s727_s1 = inlined_call_operand.hbm [shape: f32[8,16], index: 1, kind: input, shape index: {}]   ;;  %s728_s2 = inlined_call_operand.hbm [shape: f32[8,16], index: 2, kind: input, shape index: {}]   ;;  %s729_s3 = inlined_call_operand.vmem [shape: f32[8,32], index: 3, kind: input, shape index: {}]   ;;  %s730_s4 = inlined_call_operand.hbm [shape: f32[8,32], index: 4, kind: input, shape index: {}]   ;;  %s731_s5 = inlined_call_operand.vmem [shape: f32[8,64], index: 5, kind: input, shape index: {}]   ;;  %s732_s6 = inlined_call_operand.hbm [shape: f32[8,64], index: 6, kind: input, shape index: {}]   ;;  %s733_s7 = inlined_call_operand.vmem [shape: f32[8,1], index: 7, kind: output, shape index: {}]  }
   0x1   :  { %14 = vsyncpa [#allocation12], 0 }
   0x2   :  { %15 = vsyncpa [#allocation15], 0  ;;  %s569_s24 = smov [#allocation11]   ;;  %s570_s26 = smov [#allocation9]  }
   0x3   :  { %s34_s25 = sshll.u32 %s569_s24, 4  ;;  %s24_s27 = sshll.u32 %s570_s26, 4  ;;  %s35_s25 = int_to_ptr.vmem [resolvable:$true] %s34_s25  ;;  %s25_s27 = int_to_ptr.vmem [resolvable:$true] %s24_s27 }
   0x4   :  { %s475_s30 = scalar_lea.hbm %s728_s2, 128 }
   0x5   :  { %p476_p0 = scmp.ne.s32.totalorder %s728_s2, %s475_s30  ;;  %p479_p1 = scmp.lt.u32.totalorder %s475_s30, %s728_s2 }
   0x7   :  { %p481_p2 = pnand %p479_p1, %p476_p0 }
   0x9   :  { %484 = shalt.err (!%p481_p2)
}
   0xa   :  { %s485_s12 = scalar_lea.vmem %s35_s25, 128  ;;  %p490_p4 = scmp.lt.s32.totalorder %s35_s25, %s35_s25 }
   0xb   :  { %p486_p3 = scmp.ne.s32.totalorder %s35_s25, %s485_s12  ;;  %p491_p5 = scmp.lt.s32.totalorder %s485_s12, %s485_s12 }
   0xd   :  { %p492_p6 = por %p491_p5, %p490_p4 }
   0xf   :  { %p493_p7 = pnand %p492_p6, %p486_p3 }
  0x11   :  { %496 = shalt.err (!%p493_p7)
}
  0x12   :  { %37 = dma.hbm_to_vmem [thread:$0]  %s728_s2, 128, %s35_s25, [#allocation12]  }
  0x13   :  { %s497_s17 = scalar_lea.hbm %s727_s1, 128 }
  0x14   :  { %p498_p8 = scmp.ne.s32.totalorder %s727_s1, %s497_s17  ;;  %p501_p9 = scmp.lt.u32.totalorder %s497_s17, %s727_s1 }
  0x16   :  { %p503_p10 = pnand %p501_p9, %p498_p8 }
  0x18   :  { %506 = shalt.err (!%p503_p10)
}
  0x19   :  { %s507_s22 = scalar_lea.vmem %s25_s27, 128  ;;  %p512_p12 = scmp.lt.s32.totalorder %s25_s27, %s25_s27 }
  0x1a   :  { %p508_p11 = scmp.ne.s32.totalorder %s25_s27, %s507_s22  ;;  %p513_p13 = scmp.lt.s32.totalorder %s507_s22, %s507_s22 }
  0x1c   :  { %p514_p0 = por %p513_p13, %p512_p12 }
  0x1e   :  { %p515_p1 = pnand %p514_p0, %p508_p11 }
  0x20   :  { %518 = shalt.err (!%p515_p1)
}
  0x21   :  { %27 = dma.hbm_to_vmem [thread:$0]  %s727_s1, 128, %s25_s27, [#allocation10]  }
  0x22   :  { %s571_s24 = smov [#allocation13]   ;;  %s572_s26 = smov [#allocation14]  }
  0x23   :  { %s46_s25 = sshll.u32 %s571_s24, 4  ;;  %s58_s28 = sshll.u32 %s572_s26, 4  ;;  %s47_s25 = int_to_ptr.vmem [resolvable:$true] %s46_s25  ;;  %s59_s28 = int_to_ptr.vmem [resolvable:$true] %s58_s28 }
  0x24   :  { %s519_s8 = scalar_lea.hbm %s730_s4, 128 }
  0x25   :  { %p520_p2 = scmp.ne.s32.totalorder %s730_s4, %s519_s8  ;;  %p523_p3 = scmp.lt.u32.totalorder %s519_s8, %s730_s4 }
  0x27   :  { %p525_p4 = pnand %p523_p3, %p520_p2 }
  0x29   :  { %528 = shalt.err (!%p525_p4)
}
  0x2a   :  { %s529_s1 = scalar_lea.vmem %s47_s25, 128  ;;  %p534_p6 = scmp.lt.s32.totalorder %s47_s25, %s47_s25 }
  0x2b   :  { %p530_p5 = scmp.ne.s32.totalorder %s47_s25, %s529_s1  ;;  %p535_p7 = scmp.lt.s32.totalorder %s529_s1, %s529_s1 }
  0x2d   :  { %p536_p8 = por %p535_p7, %p534_p6 }
  0x2f   :  { %p537_p9 = pnand %p536_p8, %p530_p5 }
  0x31   :  { %540 = shalt.err (!%p537_p9)
}
  0x32   :  { %49 = dma.hbm_to_vmem [thread:$0]  %s730_s4, 128, %s47_s25, [#allocation12]  }
  0x33   :  { %s541_s16 = scalar_lea.hbm %s732_s6, 128 }
  0x34   :  { %p542_p10 = scmp.ne.s32.totalorder %s732_s6, %s541_s16  ;;  %p545_p11 = scmp.lt.u32.totalorder %s541_s16, %s732_s6 }
  0x36   :  { %p547_p12 = pnand %p545_p11, %p542_p10 }
  0x38   :  { %550 = shalt.err (!%p547_p12)
}
  0x39   :  { %s551_s21 = scalar_lea.vmem %s59_s28, 128  ;;  %p556_p0 = scmp.lt.s32.totalorder %s59_s28, %s59_s28 }
  0x3a   :  { %p552_p13 = scmp.ne.s32.totalorder %s59_s28, %s551_s21  ;;  %p557_p1 = scmp.lt.s32.totalorder %s551_s21, %s551_s21 }
  0x3c   :  { %p558_p2 = por %p557_p1, %p556_p0 }
  0x3e   :  { %p559_p3 = pnand %p558_p2, %p552_p13 }
  0x40   :  { %562 = shalt.err (!%p559_p3)
}
  0x41   :  { %61 = dma.hbm_to_vmem [thread:$0]  %s732_s6, 128, %s59_s28, [#allocation15]  }
  0x42   :  { %563 = dma.done.wait [#allocation10], 128  }
  0x43   :  { %564 = vsyncadd [#allocation10], 4294967168 }
  0x44   :  { %565 = dma.done.wait [#allocation12], 256  }
  0x45   :  { %566 = vsyncadd [#allocation12], 4294967040 }
  0x46   :  { %567 = dma.done.wait [#allocation15], 128  }
  0x47   :  { %568 = vsyncadd [#allocation15], 4294967168  ;;  %v86_v0 = vld [vmem:[#allocation13] sm:$0xff]  ;;  %vm88_vm0 = vcmask 261120   ;;  %v216_v2 = vld [vmem:[#allocation14] sm:$0xff]  ;;  %vm218_vm1 = vcmask 523264   ;;  %v346_v13 = vstv %s726_s0  ;;  %s386_s29 = smul.f32 %s726_s0, %s726_s0 }
  0x48   :  { %v85_v1 = vld [vmem:[%s729_s3] sm:$0xff]  ;;  %v94_v3 = vmul.f32 %v86_v0, %v86_v0  ;;  %v224_v5 = vmul.f32 %v216_v2, %v216_v2  ;;  %v573_v12 = vmov 0.0   ;;  %vm574_vm2 = vmmov 0   ;;  %v349_v15 = vld [vmem:[#allocation9] sm:$0xff]  ;;  %v352_v38 = vld [vmem:[#allocation11] sm:$0xff] }
  0x49   :  { %v87_v4 = vmul.f32 %v85_v1, %v85_v1  ;;  %v215_v6 = vld [vmem:[%s731_s5] sm:$0xff]  ;;  %421 = vmatprep.subr.mxu0 %v573_v12  ;;  %426 = vmatprep.subr.mxu1 %v573_v12  ;;  %443 = vrcp.f32 %v346_v13  ;;  %vm354_vm3 = vcmask 130048   ;;  %vm78_vm4 = vcmask 7168  }
  0x4a   :  { %v217_v7 = vmul.f32 %v215_v6, %v215_v6  ;;  %v95_v8 = vsel %vm88_vm0, %v94_v3, 0.0  ;;  %v225_v10 = vsel %vm218_vm1, %v224_v5, 0.0  ;;  %423 = vmatprep.mubr.msk.f32.mxu0 %vm574_vm2, %v573_v12  ;;  %428 = vmatprep.mubr.msk.f32.mxu1 %vm574_vm2, %v573_v12  ;;  %v575_v37 = vmov -inf   ;;  %80 = vst.msk [vmem:[#allocation3] sm:$0xff] %vm78_vm4, %v573_v12  ;;  %81 = vst.msk [vmem:[#allocation4] sm:$0xff] %vm78_vm4, %v573_v12 }
  0x4b   :  { %v89_v9 = vsel %vm88_vm0, %v87_v4, 0.0  ;;  %96 = vadd.xlane.f32.xlu0 %v95_v8  ;;  %79 = vst.msk [vmem:[#allocation2] sm:$0xff] %vm78_vm4, %v575_v37  ;;  %82 = vst.msk [vmem:[#allocation5] sm:$0xff] %vm78_vm4, %v575_v37  ;;  %vm180_vm5 = vcmask 64512   ;;  %v576_v49 = vmov 0  }
  0x4c   :  { %90 = vadd.xlane.f32.xlu1 %v89_v9  ;;  %v219_v11 = vsel %vm218_vm1, %v217_v7, 0.0  ;;  %83 = vst.msk [vmem:[#allocation6] sm:$0xff] %vm78_vm4, %v573_v12  ;;  %84 = vst.msk [vmem:[#allocation7] sm:$0xff] %vm78_vm4, %v573_v12  ;;  %441 = vset.pattern.permute.xlu0 %v576_v49 }
  0x4d   :  { %442 = vset.pattern.permute.xlu1 %v576_v49 }
  0x4f   :  { %226 = vadd.xlane.f32.xlu0 %v225_v10 }
  0x50   :  { %220 = vadd.xlane.f32.xlu1 %v219_v11 }
  0x52   :  { %v179_v50 = vld [vmem:[#allocation2] sm:$0xff]  ;;  %v309_v54 = vld [vmem:[#allocation5] sm:$0xff] }
  0x53   :  { %v444_v14 = vpop.eup %443 }
  0x54   :  { %431 = vpush %v444_v14 }
  0x85   :  { %s678_s6 = spop %431 }
  0x86   :  { %v350_v16 = vstv %s678_s6 }
  0x87   :  { %v681_v17 = vmul.f32 %v350_v16, %v349_v15  ;;  %v353_v42 = vmul.f32 %v352_v38, %v350_v16 }
  0x89   :  { %v355_v18 = vsel %vm354_vm3, %v681_v17, -inf  ;;  %v367_v47 = vsel %vm354_vm3, %v353_v42, -inf }
  0x8a   :  { %356 = vmax.xlane.f32.xlu1 %v355_v18 }
  0xd8   :  { %v97_v19 = vpop.xlane.xlu0 %96 }
  0xd9   :  { %v91_v20 = vpop.xlane.xlu1 %90  ;;  %v98_v21 = vmax.f32 %v97_v19, 1e-24 }
  0xda   :  { %v92_v22 = vmax.f32 %v91_v20, 1e-24 }
  0xdb   :  { %445 = vrsqrt.f32 %v98_v21 }
  0xdc   :  { %447 = vrsqrt.f32 %v92_v22  ;;  %v227_v23 = vpop.xlane.xlu0 %226 }
  0xdd   :  { %v221_v24 = vpop.xlane.xlu1 %220  ;;  %v228_v25 = vmax.f32 %v227_v23, 1e-24 }
  0xde   :  { %v222_v26 = vmax.f32 %v221_v24, 1e-24 }
  0xdf   :  { %449 = vrsqrt.f32 %v228_v25 }
  0xe0   :  { %451 = vrsqrt.f32 %v222_v26 }
  0xe5   :  { %v446_v27 = vpop.eup %445 }
  0xe6   :  { %v448_v28 = vpop.eup %447  ;;  %v101_v29 = vmul.f32 %v446_v27, %v86_v0 }
  0xe7   :  { %v100_v30 = vmul.f32 %v448_v28, %v85_v1 }
  0xe8   :  { %422 = vmatpush3.xpose.msk.msra.mxu0 %vm88_vm0, %v101_v29 }
  0xe9   :  { %v450_v31 = vpop.eup %449  ;;  %v686_v32 = vmul.f32 %v101_v29, %v100_v30 }
  0xea   :  { %v452_v33 = vpop.eup %451  ;;  %v231_v34 = vmul.f32 %v450_v31, %v216_v2 }
  0xeb   :  { %424 = vmatmul.mubr.msk.f32.vlgmr.msra.gmra.mrb[0].mxu0 %vm88_vm0, %v100_v30  ;;  %v230_v35 = vmul.f32 %v452_v33, %v215_v6  ;;  %v210_v14 = vsel %vm88_vm0, %v686_v32, 0.0  ;;  %v188_v32 = vld [vmem:[#allocation3] sm:$0xff] }
  0xec   :  { %427 = vmatpush3.xpose.msk.msra.mxu1 %vm218_vm1, %v231_v34 }
  0xed   :  { %v690_v36 = vmul.f32 %v231_v34, %v230_v35 }
  0xef   :  { %429 = vmatmul.mubr.msk.f32.vlgmr.msra.gmra.mrb[0].mxu1 %vm218_vm1, %v230_v35  ;;  %v337_v15 = vsel %vm218_vm1, %v690_v36, 0.0  ;;  %v317_v36 = vld [vmem:[#allocation6] sm:$0xff] }
 0x117   :  { %v357_v51 = vpop.xlane.xlu1 %356 }
 0x118   :  { %v358_v62 = vsub.f32 %v681_v17, %v357_v51 }
 0x11a   :  { %v359_v63 = vmul.f32 1.442695, %v358_v62 }
 0x1be   :  { %v174_v39 = vpop.f32.mrb[0].mxu0 }
 0x1bf   :  { %v178_v40 = vmul.f32 14.285714, %v174_v39  ;;  %v425_v41 = vpop.f32.mrb[1].mxu0 }
 0x1c1   :  { %v181_v43 = vsel %vm180_vm5, %v178_v40, -inf }
 0x1c2   :  { %182 = vmax.xlane.f32.xlu0 %v181_v43  ;;  %v304_v44 = vpop.f32.mrb[0].mxu1 }
 0x1c3   :  { %v308_v45 = vmul.f32 14.285714, %v304_v44  ;;  %v430_v46 = vpop.f32.mrb[1].mxu1 }
 0x1c5   :  { %v310_v48 = vsel %vm180_vm5, %v308_v45, -inf }
 0x1c6   :  { %368 = vmax.xlane.f32.xlu0 %v367_v47  ;;  %311 = vmax.xlane.f32.xlu1 %v310_v48 }
 0x24f   :  { %v183_v52 = vpop.xlane.xlu0 %182 }
 0x250   :  { %v184_v53 = vmax.f32 %v179_v50, %v183_v52 }
 0x252   :  { %v185_v55 = vsub.f32 %v179_v50, %v184_v53  ;;  %204 = vst.msk [vmem:[#allocation2] sm:$0xff] %vm78_vm4, %v184_v53  ;;  %192 = vperm.xlu0 %441, %v184_v53   ;;  %v387_v53 = vstv %s386_s29 }
 0x253   :  { %v312_v56 = vpop.xlane.xlu1 %311  ;;  %v369_v59 = vpop.xlane.xlu0 %368 }
 0x254   :  { %v313_v57 = vmax.f32 %v309_v54, %v312_v56  ;;  %v370_v60 = vsub.f32 %v353_v42, %v369_v59  ;;  %v186_v29 = vmul.f32 1.442695, %v185_v55 }
 0x256   :  { %v314_v58 = vsub.f32 %v309_v54, %v313_v57  ;;  %332 = vst.msk [vmem:[#allocation5] sm:$0xff] %vm78_vm4, %v313_v57  ;;  %321 = vperm.xlu1 %442, %v313_v57   ;;  %v371_v61 = vmul.f32 1.442695, %v370_v60 }
 0x258   :  { %453 = vpow2.f32 %v371_v61  ;;  %v315_v30 = vmul.f32 1.442695, %v314_v58 }
 0x259   :  { %455 = vpow2.f32 %v359_v63  ;;  %v389_v51 = vld [vmem:[#allocation2] sm:$0xff] }
 0x25d   :  { %v394_v54 = vld [vmem:[#allocation5] sm:$0xff] }
 0x262   :  { %v454_v0 = vpop.eup %453 }
 0x263   :  { %v373_v1 = vsel %vm354_vm3, %v454_v0, 0.0  ;;  %v456_v2 = vpop.eup %455 }
 0x264   :  { %v361_v3 = vsel %vm354_vm3, %v456_v2, 0.0 }
 0x271   :  { %374 = vadd.xlane.f32.xlu0 %v373_v1 }
 0x27a   :  { %362 = vadd.xlane.f32.xlu1 %v361_v3 }
 0x2d1   :  { %v193_v4 = vpop.permute.xlu0 %192 }
 0x2d2   :  { %v195_v5 = vsub.f32 %v178_v40, %v193_v4 }
 0x2d4   :  { %v196_v6 = vmul.f32 1.442695, %v195_v5 }
 0x2d5   :  { %v322_v7 = vpop.permute.xlu1 %321 }
 0x2d6   :  { %457 = vpow2.f32 %v196_v6  ;;  %v324_v8 = vsub.f32 %v308_v45, %v322_v7 }
 0x2d8   :  { %v325_v9 = vmul.f32 1.442695, %v324_v8 }
 0x2da   :  { %459 = vpow2.f32 %v325_v9 }
 0x2e0   :  { %v458_v10 = vpop.eup %457 }
 0x2e1   :  { %v198_v11 = vsel %vm180_vm5, %v458_v10, 0.0 }
 0x2e2   :  { %199 = vadd.xlane.f32.xlu1 %v198_v11 }
 0x2e4   :  { %v460_v12 = vpop.eup %459 }
 0x2e5   :  { %v327_v13 = vsel %vm180_vm5, %v460_v12, 0.0 }
 0x2e6   :  { %328 = vadd.xlane.f32.xlu1 %v327_v13 }
 0x2ea   :  { %211 = vadd.xlane.f32.xlu1 %v210_v14 }
 0x2ee   :  { %338 = vadd.xlane.f32.xlu1 %v337_v15 }
 0x2fe   :  { %v375_v16 = vpop.xlane.xlu0 %374 }
 0x2ff   :  { %461 = vlog2.f32 %v375_v16 }
 0x307   :  { %v363_v17 = vpop.xlane.xlu1 %362 }
 0x308   :  { %463 = vlog2.f32 %v363_v17 }
 0x309   :  { %465 = vrcp.f32 %v375_v16  ;;  %v462_v18 = vpop.eup %461 }
 0x30a   :  { %v377_v19 = vmul.f32 0.6931472, %v462_v18  ;;  %467 = vpow2.f32 %v186_v29 }
 0x30b   :  { %469 = vpow2.f32 %v315_v30 }
 0x30c   :  { %v378_v23 = vsub.f32 %v370_v60, %v377_v19 }
 0x312   :  { %v464_v20 = vpop.eup %463 }
 0x313   :  { %v365_v21 = vmul.f32 0.6931472, %v464_v20  ;;  %v466_v22 = vpop.eup %465 }
 0x314   :  { %v380_v25 = vmul.f32 %v466_v22, %v454_v0  ;;  %v468_v31 = vpop.eup %467 }
 0x315   :  { %v366_v24 = vsub.f32 %v358_v62, %v365_v21  ;;  %v189_v33 = vmul.f32 %v468_v31, %v188_v32  ;;  %v470_v34 = vpop.eup %469 }
 0x316   :  { %v318_v38 = vmul.f32 %v470_v34, %v317_v36 }
 0x317   :  { %v381_v26 = vsub.f32 %v378_v23, %v366_v24 }
 0x319   :  { %v382_v27 = vmul.f32 %v381_v26, %v380_v25 }
 0x31b   :  { %v383_v28 = vsel %vm354_vm3, %v382_v27, 0.0 }
 0x31c   :  { %384 = vadd.xlane.f32.xlu1 %v383_v28 }
 0x36f   :  { %v200_v35 = vpop.xlane.xlu1 %199 }
 0x370   :  { %v201_v37 = vadd.f32 %v200_v35, %v189_v33 }
 0x372   :  { %203 = vst.msk [vmem:[#allocation3] sm:$0xff] %vm78_vm4, %v201_v37 }
 0x373   :  { %v329_v39 = vpop.xlane.xlu1 %328 }
 0x374   :  { %v330_v40 = vadd.f32 %v329_v39, %v318_v38 }
 0x376   :  { %331 = vst.msk [vmem:[#allocation6] sm:$0xff] %vm78_vm4, %v330_v40 }
 0x377   :  { %v212_v41 = vpop.xlane.xlu1 %211 }
 0x378   :  { %v213_v42 = vmul.f32 14.285714, %v212_v41 }
 0x379   :  { %v390_v45 = vld [vmem:[#allocation3] sm:$0xff] }
 0x37a   :  { %214 = vst.msk [vmem:[#allocation4] sm:$0xff] %vm78_vm4, %v213_v42  ;;  %471 = vlog2.f32 %v390_v45 }
 0x37b   :  { %v339_v43 = vpop.xlane.xlu1 %338 }
 0x37c   :  { %v340_v44 = vmul.f32 14.285714, %v339_v43 }
 0x37d   :  { %v395_v46 = vld [vmem:[#allocation6] sm:$0xff] }
 0x37e   :  { %341 = vst.msk [vmem:[#allocation7] sm:$0xff] %vm78_vm4, %v340_v44  ;;  %473 = vlog2.f32 %v395_v46 }
 0x381   :  { %v399_v56 = vld [vmem:[#allocation4] sm:$0xff] }
 0x384   :  { %v472_v47 = vpop.eup %471 }
 0x385   :  { %v392_v49 = vmul.f32 0.6931472, %v472_v47  ;;  %v402_v60 = vld [vmem:[#allocation7] sm:$0xff] }
 0x387   :  { %v393_v52 = vadd.f32 %v392_v49, %v389_v51 }
 0x388   :  { %v474_v48 = vpop.eup %473 }
 0x389   :  { %v397_v50 = vmul.f32 0.6931472, %v474_v48  ;;  %v400_v59 = vsub.f32 %v393_v52, %v399_v56 }
 0x38b   :  { %v398_v55 = vadd.f32 %v397_v50, %v394_v54 }
 0x38d   :  { %v403_v61 = vsub.f32 %v398_v55, %v402_v60 }
 0x3a9   :  { %v385_v57 = vpop.xlane.xlu1 %384 }
 0x3aa   :  { %v388_v58 = vmul.f32 %v387_v53, %v385_v57 }
 0x3ac   :  { %v401_v62 = vadd.f32 %v400_v59, %v388_v58 }
 0x3ae   :  { %v404_v63 = vadd.f32 %v403_v61, %v401_v62 }
 0x3b0   :  { %405 = vst.msk [vmem:[%s733_s7] sm:$0xff] %vm78_vm4, %v404_v63 }
 0x3b1   :  { %410 = vsyncpa [#allocation10], 1 }
 0x3b2   :  { %411 = vsyncpa [#allocation12], 1 }
 0x3b3   :  { %412 = vsyncpa [#allocation15], 1 }

</bundles_post_ra>
